<compile_context>
chip_gen: v7x
topology: tpu7x:2x2x1
jax: 0.10.0
libtpu: 0.0.40
codegen_flags: <defaults>
</compile_context>

<pallas_src>
import functools

import numpy as np
import jax
import jax.numpy as jnp
from jax.experimental import pallas as pl
from jax.experimental.pallas import tpu as pltpu


def _round_up(x, m):
    return (x + m - 1) // m * m


def _prefer_wide_tn():
    # v6e/v7x MXUs are 2x256x256 -> TN=256; v5e/v5p are 128-wide -> TN=128.
    try:
        kind = jax.devices()[0].device_kind.lower()
    except Exception:
        return True
    return "v5" not in kind


def _mm_bias_relu_kernel(p_ref, w_ref, b_ref, o_ref, acc_ref):
    # p_ref: [TM, TK], w_ref: [TK, TN], b_ref: [1, TN] (f32),
    # o_ref: [TM, TN] (compute dtype), acc_ref: [TM, TN] f32 scratch that
    # persists across the innermost (K) grid axis.
    k = pl.program_id(2)

    @pl.when(k == 0)
    def _():
        acc_ref[...] = jnp.zeros_like(acc_ref)

    acc_ref[...] += jnp.dot(p_ref[...], w_ref[...],
                            preferred_element_type=jnp.float32)

    @pl.when(k == pl.num_programs(2) - 1)
    def _():
        o_ref[...] = jnp.maximum(acc_ref[...] + b_ref[...], 0.0).astype(o_ref.dtype)


def conv_relu_nhwc(x_nhwc, weight, bias, padding, *,
                   tile_m=512, compute_dtype=jnp.bfloat16):
    """Conv2d(stride=1, dilation=1, padding=padding) + ReLU, NHWC in / NHWC out.

    Compute runs in `compute_dtype` (bf16 by default — MXU native on
    v5e/v6e/v7x) with f32 accumulation; the output is returned in
    `compute_dtype`.  Pass compute_dtype=jnp.float32 for bit-tighter results.
    """
    N, H, W, C = x_nhwc.shape
    OC, _, KH, KW = weight.shape
    Ho = H + 2 * padding - KH + 1          # stride=1, dilation=1 only
    Wo = W + 2 * padding - KW + 1

    M = N * Ho * Wo
    K = KH * KW * C

    esz = np.dtype(compute_dtype).itemsize
    k_align = 8 * (4 // esz)               # sublane packing: 8 f32, 16 bf16

    TM = tile_m                             # 512-row lane-dense tiles
    Mp = _round_up(M, TM)
    OCp = _round_up(OC, 128)                # lane-dense output channels

    # --- K tiling: one full-K block when small, ~512-wide 128-aligned tiles otherwise
    if K <= 512:
        TK = Kp = _round_up(K, k_align)
        nk = 1
    else:
        nk = -(-K // 512)
        TK = _round_up(-(-K // nk), 128)
        Kp = TK * nk

    # --- weight residency: constant block index -> single HBM pass over the weight
    resident = (nk == 1
                and Kp * OCp * esz <= 4 * 2**20
                and TM * OCp * 4 <= 16 * 2**20)
    if resident:
        TN = OCp
    else:
        TN = 256 if (OCp % 256 == 0 and _prefer_wide_tn()) else 128
    nj = OCp // TN
    ni = Mp // TM

    # ---- glue (HBM side): NHWC im2col, cast to compute dtype BEFORE slicing ----
    # TODO(synk): fuse patch extraction into the kernel (halo DMA over an NHWC
    # input block) to remove the KH*KW im2col read amplification.
    xc = x_nhwc.astype(compute_dtype)
    xp = jnp.pad(xc, ((0, 0), (padding, padding), (padding, padding), (0, 0)))
    cols = [xp[:, kh:kh + Ho, kw:kw + Wo, :]              # each [N, Ho, Wo, C]
            for kh in range(KH) for kw in range(KW)]
    patches = jnp.concatenate(cols, axis=-1).reshape(M, K)  # K order = (kh, kw, c)
    patches = jnp.pad(patches, ((0, Mp - M), (0, Kp - K)))

    # weight [OC, C, KH, KW] -> [KH, KW, C, OC] -> [K, OC], matching (kh, kw, c)
    w2 = weight.astype(compute_dtype).transpose(2, 3, 1, 0).reshape(K, OC)
    w2 = jnp.pad(w2, ((0, Kp - K), (0, OCp - OC)))
    b2 = jnp.pad(bias.reshape(1, OC).astype(jnp.float32), ((0, 0), (0, OCp - OC)))

    # ---- VMEM budget (double-buffered blocks + f32 accumulator), capped at
    # 48 MiB: safe headroom under v7x's 64 MiB per-TC VMEM, fine on v5e/v6e.
    block_bytes = (2 * TM * TK * esz        # patches tile
                   + 2 * TK * TN * esz      # weight tile
                   + 2 * TN * 4             # bias tile
                   + 2 * TM * TN * esz      # output tile (compute dtype)
                   + TM * TN * 4)           # accumulator scratch
    vmem_limit = int(min(48 * 2**20, max(16 * 2**20, 2 * block_bytes)))

    bytes_accessed = int(Mp * Kp * esz * nj
                         + Kp * OCp * esz * (1 if resident else ni)
                         + OCp * 4
                         + Mp * OCp * esz)

    y = pl.pallas_call(
        _mm_bias_relu_kernel,
        out_shape=jax.ShapeDtypeStruct((Mp, OCp), compute_dtype),
        grid=(ni, nj, nk),
        in_specs=[
            pl.BlockSpec((TM, TK), lambda i, j, k: (i, k)),
            pl.BlockSpec((TK, TN), lambda i, j, k: (k, j)),
            pl.BlockSpec((1, TN), lambda i, j, k: (0, j)),   # constant across k
        ],
        out_specs=pl.BlockSpec((TM, TN), lambda i, j, k: (i, j)),
        scratch_shapes=[pltpu.VMEM((TM, TN), jnp.float32)],
        compiler_params=pltpu.CompilerParams(
            dimension_semantics=("parallel", "parallel", "arbitrary"),
            vmem_limit_bytes=vmem_limit),
        cost_estimate=pl.CostEstimate(
            flops=2 * Mp * Kp * OCp,
            transcendentals=0,
            bytes_accessed=bytes_accessed),
    )(patches, w2, b2)

    return y[:M, :OC].reshape(N, Ho, Wo, OC)


def conv_relu(x, weight, bias, padding, **kwargs):
    """PyTorch-compatible NCHW wrapper around the NHWC core.

    Prefer conv_relu_nhwc end-to-end inside a network: the NCHW<->NHWC
    transposes here exist only to match nn.Conv2d's external layout.
    """
    y = conv_relu_nhwc(jnp.transpose(x, (0, 2, 3, 1)), weight, bias, padding,
                       **kwargs)
    return jnp.transpose(y, (0, 3, 1, 2))


if __name__ == "__main__":
    # ConvRelu(in_channels=4, out_channels=8, kernel=3, padding=1)
    N, C, H, W = 2, 4, 16, 16
    OC, KH, KW, PAD = 8, 3, 3, 1

    key = jax.random.PRNGKey(0)
    kx, kw_, kb = jax.random.split(key, 3)

    x = jax.random.normal(kx, (N, C, H, W), dtype=jnp.float32)
    # deterministic parameter init (PyTorch-like uniform fan-in scaling)
    fan_in = C * KH * KW
    bound = 1.0 / (fan_in ** 0.5)
    weight = jax.random.uniform(kw_, (OC, C, KH, KW), jnp.float32, -bound, bound)
    bias = jax.random.uniform(kb, (OC,), jnp.float32, -bound, bound)

    fwd = jax.jit(functools.partial(conv_relu, padding=PAD))
    out = jax.block_until_ready(fwd(x, weight, bias))

    # Reference: XLA conv + bias + ReLU on bf16-rounded inputs (matches the
    # kernel's compute path; accumulation is f32 in both).
    xb = x.astype(jnp.bfloat16).astype(jnp.float32)
    wb = weight.astype(jnp.bfloat16).astype(jnp.float32)
    ref = jax.lax.conv_general_dilated(
        xb, wb, window_strides=(1, 1), padding=((PAD, PAD), (PAD, PAD)),
        dimension_numbers=("NCHW", "OIHW", "NCHW"))
    ref = jnp.maximum(ref + bias[None, :, None, None], 0.0)

    assert out.shape == (N, OC, H, W)
    assert out.dtype == jnp.bfloat16
    assert jnp.allclose(out.astype(jnp.float32), ref, atol=2e-2, rtol=2e-2)

    print("KERNEL_OK")
</pallas_src>

<mosaic_0001>
module attributes {stable_mosaic.version = 11 : i64} {
  func.func @_mm_bias_relu_kernel(%arg0: i32, %arg1: i32, %arg2: i32, %arg3: memref<512x48xbf16, #tpu.memory_space<vmem>>, %arg4: memref<48x128xbf16, #tpu.memory_space<vmem>>, %arg5: memref<1x128xf32, #tpu.memory_space<vmem>>, %arg6: memref<512x128xbf16, #tpu.memory_space<vmem>>, %arg7: memref<512x128xf32, #tpu.memory_space<vmem>>) attributes {dimension_semantics = [#tpu.dimension_semantics<parallel>, #tpu.dimension_semantics<parallel>, #tpu.dimension_semantics<arbitrary>], iteration_bounds = array<i64: 1, 1, 1>, scalar_prefetch = 0 : i64, scratch_operands = 1 : i64, tpu.core_type = #tpu.core_type<tc>, window_params = [{transform_indices = @transform_0, window_bounds = array<i64: 512, 48>}, {transform_indices = @transform_1, window_bounds = array<i64: 48, 128>}, {transform_indices = @transform_2, window_bounds = array<i64: 1, 128>}, {transform_indices = @transform_3, window_bounds = array<i64: 512, 128>}]} {
    %c0_i32 = arith.constant 0 : i32
    %0 = arith.cmpi eq, %arg2, %c0_i32 : i32
    %1 = arith.extui %0 : i1 to i32
    %c0_i32_0 = arith.constant 0 : i32
    %2 = arith.cmpi ne, %1, %c0_i32_0 : i32
    scf.if %2 {
      %cst_10 = arith.constant 0.000000e+00 : f32
      %12 = vector.broadcast %cst_10 : f32 to vector<512x128xf32>
      %c0_11 = arith.constant 0 : index
      %c0_12 = arith.constant 0 : index
      %13 = vector.load %arg7[%c0_11, %c0_12] : memref<512x128xf32, #tpu.memory_space<vmem>>, vector<512x128xf32>
      tpu.vector_store %arg7[%c0_11, %c0_12], %12 {strides = array<i32>} : memref<512x128xf32, #tpu.memory_space<vmem>>, vector<512x128xf32>,
    } else {
    }
    %c0 = arith.constant 0 : index
    %c0_1 = arith.constant 0 : index
    %3 = vector.load %arg7[%c0, %c0_1] : memref<512x128xf32, #tpu.memory_space<vmem>>, vector<512x128xf32>
    %c0_2 = arith.constant 0 : index
    %c0_3 = arith.constant 0 : index
    %4 = vector.load %arg3[%c0_2, %c0_3] : memref<512x48xbf16, #tpu.memory_space<vmem>>, vector<512x48xbf16>
    %c0_4 = arith.constant 0 : index
    %c0_5 = arith.constant 0 : index
    %5 = vector.load %arg4[%c0_4, %c0_5] : memref<48x128xbf16, #tpu.memory_space<vmem>>, vector<48x128xbf16>
    %cst = arith.constant dense<0.000000e+00> : vector<512x128xf32>
    %6 = tpu.matmul %4, %5, %cst {dimension_numbers = #tpu.dot_dimension_numbers<[1], [0], [0], [1], [0, 0, 1, 1], [], []>} : vector<512x48xbf16>, vector<48x128xbf16>, vector<512x128xf32> -> vector<512x128xf32>
    %7 = arith.addf %3, %6 : vector<512x128xf32>
    %c0_6 = arith.constant 0 : index
    %c0_7 = arith.constant 0 : index
    %8 = vector.load %arg7[%c0_6, %c0_7] : memref<512x128xf32, #tpu.memory_space<vmem>>, vector<512x128xf32>
    tpu.vector_store %arg7[%c0_6, %c0_7], %7 {strides = array<i32>} : memref<512x128xf32, #tpu.memory_space<vmem>>, vector<512x128xf32>,
    %c0_i32_8 = arith.constant 0 : i32
    %9 = arith.cmpi eq, %arg2, %c0_i32_8 : i32
    %10 = arith.extui %9 : i1 to i32
    %c0_i32_9 = arith.constant 0 : i32
    %11 = arith.cmpi ne, %10, %c0_i32_9 : i32
    scf.if %11 {
      %c0_10 = arith.constant 0 : index
      %c0_11 = arith.constant 0 : index
      %12 = vector.load %arg7[%c0_10, %c0_11] : memref<512x128xf32, #tpu.memory_space<vmem>>, vector<512x128xf32>
      %c0_12 = arith.constant 0 : index
      %c0_13 = arith.constant 0 : index
      %13 = vector.load %arg5[%c0_12, %c0_13] : memref<1x128xf32, #tpu.memory_space<vmem>>, vector<1x128xf32>
      %14 = vector.broadcast %13 : vector<1x128xf32> to vector<512x128xf32>
      %15 = arith.addf %12, %14 : vector<512x128xf32>
      %cst_14 = arith.constant 0.000000e+00 : f32
      %16 = vector.broadcast %cst_14 : f32 to vector<512x128xf32>
      %17 = arith.maximumf %15, %16 : vector<512x128xf32>
      %18 = arith.truncf %17 : vector<512x128xf32> to vector<512x128xbf16>
      %c0_15 = arith.constant 0 : index
      %c0_16 = arith.constant 0 : index
      %19 = vector.load %arg6[%c0_15, %c0_16] : memref<512x128xbf16, #tpu.memory_space<vmem>>, vector<512x128xbf16>
      tpu.vector_store %arg6[%c0_15, %c0_16], %18 {strides = array<i32>} : memref<512x128xbf16, #tpu.memory_space<vmem>>, vector<512x128xbf16>,
    } else {
    }
    return
  }
  func.func @transform_0(%arg0: i32, %arg1: i32, %arg2: i32) -> (i32, i32) {
    %c0_i32 = arith.constant 0 : i32
    return %arg0, %arg2 : i32, i32
  }
  func.func @transform_1(%arg0: i32, %arg1: i32, %arg2: i32) -> (i32, i32) {
    %c0_i32 = arith.constant 0 : i32
    return %arg2, %arg1 : i32, i32
  }
  func.func @transform_2(%arg0: i32, %arg1: i32, %arg2: i32) -> (i32, i32) {
    %c0_i32 = arith.constant 0 : i32
    %c0_i32_0 = arith.constant 0 : i32
    return %c0_i32, %arg1 : i32, i32
  }
  func.func @transform_3(%arg0: i32, %arg1: i32, %arg2: i32) -> (i32, i32) {
    %c0_i32 = arith.constant 0 : i32
    return %arg0, %arg1 : i32, i32
  }
}

</mosaic_0001>

<bundles_post_ra>
// kernel: conv_relu.1
= control target key start
LH: loop header
LB: loop body
LE: loop exit
PB: predicated region body
PF: predicated region fallthrough
CT: control target
= control target key end

     0   :  { %vm395_vm0 = vcmask 392192   ;;  %s2290_s1 = inlined_call_operand.vmem [shape: bf16[48,128], index: 1, kind: input, shape index: {}]   ;;  %s2291_s0 = inlined_call_operand.vmem [shape: bf16[512,48], index: 0, kind: input, shape index: {}]   ;;  %s2292_s2 = inlined_call_operand.vmem [shape: f32[1,128], index: 2, kind: input, shape index: {}]   ;;  %s2293_s3 = inlined_call_operand.vmem [shape: bf16[512,128], index: 3, kind: output, shape index: {}]  }
   0x1   :  { %v1933_v0 = vld [vmem:[%s2290_s1] sm:$0xff]   ;;  %v1934_v1 = vld [vmem:[%s2290_s1 + $0x8] sm:$0xff]   ;;  %v1935_v2 = vld [vmem:[%s2290_s1 + $0x10] sm:$0xff]  }
   0x2   :  { %1857 = vmatprep.subr.bf16.mxu0 %v1933_v0  ;;  %1927 = vmatprep.subr.bf16.mxu1 %v1933_v0  ;;  %v1936_v3 = vld [vmem:[%s2291_s0] sm:$0xff]   ;;  %v1938_v5 = vld [vmem:[%s2291_s0 + $0x8] sm:$0xff]   ;;  %v1940_v7 = vld [vmem:[%s2291_s0 + $0x10] sm:$0xff]  }
   0x3   :  { %1858 = vmatpush3.bf16.msra.mxu0 %v1933_v0  ;;  %1930 = vmatpush3.bf16.msra.mxu1 %v1933_v0  ;;  %v1937_v4 = vld [vmem:[%s2291_s0 + $0x80] sm:$0xff]   ;;  %v1939_v6 = vld [vmem:[%s2291_s0 + $0x88] sm:$0xff]   ;;  %v1941_v8 = vld [vmem:[%s2291_s0 + $0x90] sm:$0xff]  }
   0x4   :  { %1859 = vmatprep.subr.bf16.mxu0 %v1934_v1  ;;  %1928 = vmatprep.subr.bf16.mxu1 %v1934_v1  ;;  %v1942_v9 = vld [vmem:[%s2291_s0 + $0x18] sm:$0xff]   ;;  %v1944_v11 = vld [vmem:[%s2291_s0 + $0x20] sm:$0xff]   ;;  %v1946_v13 = vld [vmem:[%s2291_s0 + $0x28] sm:$0xff]  }
   0x5   :  { %1863 = vmatprep.mubr.msk.bf16.mxu0 %vm395_vm0, %v1936_v3  ;;  %1895 = vmatprep.mubr.msk.bf16.mxu1 %vm395_vm0, %v1937_v4  ;;  %v1943_v10 = vld [vmem:[%s2291_s0 + $0x98] sm:$0xff]   ;;  %v1945_v12 = vld [vmem:[%s2291_s0 + $0xa0] sm:$0xff]   ;;  %v1947_v14 = vld [vmem:[%s2291_s0 + $0xa8] sm:$0xff]  }
   0x6   :  { %v1948_v15 = vld [vmem:[%s2291_s0 + $0x30] sm:$0xff]   ;;  %v1950_v17 = vld [vmem:[%s2291_s0 + $0x38] sm:$0xff]   ;;  %v1952_v19 = vld [vmem:[%s2291_s0 + $0x40] sm:$0xff]  }
   0x7   :  { %1860 = vmatpush3.bf16.msra.mxu0 %v1934_v1  ;;  %1931 = vmatpush3.bf16.msra.mxu1 %v1934_v1  ;;  %v1949_v16 = vld [vmem:[%s2291_s0 + $0xb0] sm:$0xff]   ;;  %v1951_v18 = vld [vmem:[%s2291_s0 + $0xb8] sm:$0xff]   ;;  %v1953_v20 = vld [vmem:[%s2291_s0 + $0xc0] sm:$0xff]  }
   0x8   :  { %1861 = vmatprep.subr.bf16.mxu0 %v1935_v2  ;;  %1929 = vmatprep.subr.bf16.mxu1 %v1935_v2  ;;  %v1954_v21 = vld [vmem:[%s2291_s0 + $0x48] sm:$0xff]   ;;  %v1956_v23 = vld [vmem:[%s2291_s0 + $0x50] sm:$0xff]   ;;  %v1958_v25 = vld [vmem:[%s2291_s0 + $0x58] sm:$0xff]  }
   0x9   :  { %v1955_v22 = vld [vmem:[%s2291_s0 + $0xc8] sm:$0xff]   ;;  %v1957_v24 = vld [vmem:[%s2291_s0 + $0xd0] sm:$0xff]   ;;  %v1959_v26 = vld [vmem:[%s2291_s0 + $0xd8] sm:$0xff]  }
   0xa   :  { %v1960_v27 = vld [vmem:[%s2291_s0 + $0x60] sm:$0xff]   ;;  %v1962_v29 = vld [vmem:[%s2291_s0 + $0x68] sm:$0xff]   ;;  %v1964_v31 = vld [vmem:[%s2291_s0 + $0x70] sm:$0xff]  }
   0xb   :  { %1862 = vmatpush3.bf16.msra.mxu0 %v1935_v2  ;;  %1932 = vmatpush3.bf16.msra.mxu1 %v1935_v2  ;;  %v1961_v28 = vld [vmem:[%s2291_s0 + $0xe0] sm:$0xff]   ;;  %v1963_v30 = vld [vmem:[%s2291_s0 + $0xe8] sm:$0xff]   ;;  %v1965_v32 = vld [vmem:[%s2291_s0 + $0xf0] sm:$0xff]  }
   0xc   :  { %v1966_v33 = vld [vmem:[%s2291_s0 + $0x78] sm:$0xff]   ;;  %v2128_v35 = vld [vmem:[%s2292_s2] ss:$0 sm:$0xff] }
   0xd   :  { %v1967_v34 = vld [vmem:[%s2291_s0 + $0xf8] sm:$0xff]  }
   0xe   :  { %1864 = vmatmul.mubr.msk.bf16.vlgmr.msra.gmra.mrb[0].mxu0 %vm395_vm0, %v1938_v5  ;;  %1896 = vmatmul.mubr.msk.bf16.vlgmr.msra.gmra.mrb[0].mxu1 %vm395_vm0, %v1939_v6 }
   0xf   :  { %1867 = vmatprep.mubr.msk.bf16.mxu0 %vm395_vm0, %v1940_v7  ;;  %1899 = vmatprep.mubr.msk.bf16.mxu1 %vm395_vm0, %v1941_v8 }
  0x16   :  { %1868 = vmatmul.mubr.msk.bf16.gmra.mrb[4].mxu0 %vm395_vm0, %v1942_v9  ;;  %1900 = vmatmul.mubr.msk.bf16.gmra.mrb[4].mxu1 %vm395_vm0, %v1943_v10 }
  0x17   :  { %1871 = vmatprep.mubr.msk.bf16.mxu0 %vm395_vm0, %v1944_v11  ;;  %1903 = vmatprep.mubr.msk.bf16.mxu1 %vm395_vm0, %v1945_v12 }
  0x1e   :  { %1872 = vmatmul.mubr.msk.bf16.gmra.mrb[8].mxu0 %vm395_vm0, %v1946_v13  ;;  %1904 = vmatmul.mubr.msk.bf16.gmra.mrb[8].mxu1 %vm395_vm0, %v1947_v14 }
  0x1f   :  { %1875 = vmatprep.mubr.msk.bf16.mxu0 %vm395_vm0, %v1948_v15  ;;  %1907 = vmatprep.mubr.msk.bf16.mxu1 %vm395_vm0, %v1949_v16 }
  0x26   :  { %1876 = vmatmul.mubr.msk.bf16.gmra.mrb[12].mxu0 %vm395_vm0, %v1950_v17  ;;  %1908 = vmatmul.mubr.msk.bf16.gmra.mrb[12].mxu1 %vm395_vm0, %v1951_v18 }
  0x27   :  { %1879 = vmatprep.mubr.msk.bf16.mxu0 %vm395_vm0, %v1952_v19  ;;  %1911 = vmatprep.mubr.msk.bf16.mxu1 %vm395_vm0, %v1953_v20 }
  0x2e   :  { %1880 = vmatmul.mubr.msk.bf16.gmra.mrb[16].mxu0 %vm395_vm0, %v1954_v21  ;;  %1912 = vmatmul.mubr.msk.bf16.gmra.mrb[16].mxu1 %vm395_vm0, %v1955_v22 }
  0x2f   :  { %1883 = vmatprep.mubr.msk.bf16.mxu0 %vm395_vm0, %v1956_v23  ;;  %1915 = vmatprep.mubr.msk.bf16.mxu1 %vm395_vm0, %v1957_v24 }
  0x36   :  { %1884 = vmatmul.mubr.msk.bf16.gmra.mrb[20].mxu0 %vm395_vm0, %v1958_v25  ;;  %1916 = vmatmul.mubr.msk.bf16.gmra.mrb[20].mxu1 %vm395_vm0, %v1959_v26 }
  0x37   :  { %1887 = vmatprep.mubr.msk.bf16.mxu0 %vm395_vm0, %v1960_v27  ;;  %1919 = vmatprep.mubr.msk.bf16.mxu1 %vm395_vm0, %v1961_v28 }
  0x3e   :  { %1888 = vmatmul.mubr.msk.bf16.gmra.mrb[24].mxu0 %vm395_vm0, %v1962_v29  ;;  %1920 = vmatmul.mubr.msk.bf16.gmra.mrb[24].mxu1 %vm395_vm0, %v1963_v30 }
  0x3f   :  { %1891 = vmatprep.mubr.msk.bf16.mxu0 %vm395_vm0, %v1964_v31  ;;  %1923 = vmatprep.mubr.msk.bf16.mxu1 %vm395_vm0, %v1965_v32 }
  0x46   :  { %1892 = vmatmul.mubr.msk.bf16.gmra.mrb[28].mxu0 %vm395_vm0, %v1966_v33  ;;  %1924 = vmatmul.mubr.msk.bf16.gmra.mrb[28].mxu1 %vm395_vm0, %v1967_v34 }
  0xe1   :  { %v1865_v36 = vpop.f32.mrb[0].mxu0  ;;  %v1897_v37 = vpop.f32.mrb[0].mxu1 }
  0xe2   :  { %v985_v38 = vadd.f32 %v1865_v36, %v2128_v35  ;;  %v1017_v39 = vadd.f32 %v1897_v37, %v2128_v35  ;;  %v526_v40 = vpop.f32.mrb[1].mxu0  ;;  %v654_v41 = vpop.f32.mrb[1].mxu1 }
  0xe3   :  { %v983_v42 = vadd.f32 %v2128_v35, %v526_v40  ;;  %v1015_v43 = vadd.f32 %v2128_v35, %v654_v41  ;;  %v1866_v44 = vpop.f32.mrb[2].mxu0  ;;  %v1898_v45 = vpop.f32.mrb[2].mxu1 }
  0xe4   :  { %v986_v46 = vadd.f32 %v1866_v44, %v2128_v35  ;;  %v1018_v47 = vadd.f32 %v1898_v45, %v2128_v35  ;;  %v529_v48 = vpop.f32.mrb[3].mxu0  ;;  %v657_v49 = vpop.f32.mrb[3].mxu1  ;;  %v1049_v52 = vmax.f32 %v985_v38, 0.0  ;;  %v1081_v53 = vmax.f32 %v1017_v39, 0.0 }
  0xe5   :  { %v984_v50 = vadd.f32 %v2128_v35, %v529_v48  ;;  %v1016_v51 = vadd.f32 %v2128_v35, %v657_v49  ;;  %v1047_v56 = vmax.f32 %v983_v42, 0.0  ;;  %v1079_v57 = vmax.f32 %v1015_v43, 0.0 }
  0xe6   :  { %v1050_v54 = vmax.f32 %v986_v46, 0.0  ;;  %v1082_v55 = vmax.f32 %v1018_v47, 0.0 }
  0xe7   :  { %v1048_v58 = vmax.f32 %v984_v50, 0.0  ;;  %v1080_v59 = vmax.f32 %v1016_v51, 0.0 }
  0xe8   :  { %v1639_v60 = vpack.c.bf16 %v1050_v54, %v1049_v52  ;;  %v1719_v61 = vpack.c.bf16 %v1082_v55, %v1081_v53 }
  0xe9   :  { %v1634_v62 = vpack.c.bf16 %v1048_v58, %v1047_v56  ;;  %v1714_v63 = vpack.c.bf16 %v1080_v59, %v1079_v57  ;;  %v1869_v0 = vpop.f32.mrb[4].mxu0  ;;  %v1901_v1 = vpop.f32.mrb[4].mxu1 }
  0xea   :  { %1791 = vst [vmem:[%s2293_s3 + $0x8] sm:$0xff] %v1639_v60   ;;  %1807 = vst [vmem:[%s2293_s3 + $0x88] sm:$0xff] %v1719_v61   ;;  %v989_v2 = vadd.f32 %v1869_v0, %v2128_v35  ;;  %v1021_v3 = vadd.f32 %v1901_v1, %v2128_v35  ;;  %v542_v4 = vpop.f32.mrb[5].mxu0  ;;  %v670_v5 = vpop.f32.mrb[5].mxu1 }
  0xeb   :  { %1635 = vst [vmem:[%s2293_s3] sm:$0xff] %v1634_v62   ;;  %1806 = vst [vmem:[%s2293_s3 + $0x80] sm:$0xff] %v1714_v63   ;;  %v987_v6 = vadd.f32 %v2128_v35, %v542_v4  ;;  %v1019_v7 = vadd.f32 %v2128_v35, %v670_v5  ;;  %v1870_v8 = vpop.f32.mrb[6].mxu0  ;;  %v1902_v9 = vpop.f32.mrb[6].mxu1 }
  0xec   :  { %v990_v10 = vadd.f32 %v1870_v8, %v2128_v35  ;;  %v1022_v11 = vadd.f32 %v1902_v9, %v2128_v35  ;;  %v545_v12 = vpop.f32.mrb[7].mxu0  ;;  %v673_v13 = vpop.f32.mrb[7].mxu1  ;;  %v1053_v16 = vmax.f32 %v989_v2, 0.0  ;;  %v1085_v17 = vmax.f32 %v1021_v3, 0.0 }
  0xed   :  { %v988_v14 = vadd.f32 %v2128_v35, %v545_v12  ;;  %v1020_v15 = vadd.f32 %v2128_v35, %v673_v13  ;;  %v1051_v20 = vmax.f32 %v987_v6, 0.0  ;;  %v1083_v21 = vmax.f32 %v1019_v7, 0.0 }
  0xee   :  { %v1054_v18 = vmax.f32 %v990_v10, 0.0  ;;  %v1086_v19 = vmax.f32 %v1022_v11, 0.0 }
  0xef   :  { %v1052_v22 = vmax.f32 %v988_v14, 0.0  ;;  %v1084_v23 = vmax.f32 %v1020_v15, 0.0 }
  0xf0   :  { %v1649_v24 = vpack.c.bf16 %v1054_v18, %v1053_v16  ;;  %v1729_v25 = vpack.c.bf16 %v1086_v19, %v1085_v17 }
  0xf1   :  { %v1644_v26 = vpack.c.bf16 %v1052_v22, %v1051_v20  ;;  %v1724_v27 = vpack.c.bf16 %v1084_v23, %v1083_v21  ;;  %v1873_v28 = vpop.f32.mrb[8].mxu0  ;;  %v1905_v29 = vpop.f32.mrb[8].mxu1 }
  0xf2   :  { %1793 = vst [vmem:[%s2293_s3 + $0x18] sm:$0xff] %v1649_v24   ;;  %1809 = vst [vmem:[%s2293_s3 + $0x98] sm:$0xff] %v1729_v25   ;;  %v993_v30 = vadd.f32 %v1873_v28, %v2128_v35  ;;  %v1025_v31 = vadd.f32 %v1905_v29, %v2128_v35  ;;  %v558_v32 = vpop.f32.mrb[9].mxu0  ;;  %v686_v33 = vpop.f32.mrb[9].mxu1 }
  0xf3   :  { %1792 = vst [vmem:[%s2293_s3 + $0x10] sm:$0xff] %v1644_v26   ;;  %1808 = vst [vmem:[%s2293_s3 + $0x90] sm:$0xff] %v1724_v27   ;;  %v991_v34 = vadd.f32 %v2128_v35, %v558_v32  ;;  %v1023_v36 = vadd.f32 %v2128_v35, %v686_v33  ;;  %v1874_v37 = vpop.f32.mrb[10].mxu0  ;;  %v1906_v38 = vpop.f32.mrb[10].mxu1 }
  0xf4   :  { %v994_v39 = vadd.f32 %v1874_v37, %v2128_v35  ;;  %v1026_v40 = vadd.f32 %v1906_v38, %v2128_v35  ;;  %v561_v41 = vpop.f32.mrb[11].mxu0  ;;  %v689_v42 = vpop.f32.mrb[11].mxu1  ;;  %v1057_v45 = vmax.f32 %v993_v30, 0.0  ;;  %v1089_v46 = vmax.f32 %v1025_v31, 0.0 }
  0xf5   :  { %v992_v43 = vadd.f32 %v2128_v35, %v561_v41  ;;  %v1024_v44 = vadd.f32 %v2128_v35, %v689_v42  ;;  %v1055_v49 = vmax.f32 %v991_v34, 0.0  ;;  %v1087_v50 = vmax.f32 %v1023_v36, 0.0 }
  0xf6   :  { %v1058_v47 = vmax.f32 %v994_v39, 0.0  ;;  %v1090_v48 = vmax.f32 %v1026_v40, 0.0 }
  0xf7   :  { %v1056_v51 = vmax.f32 %v992_v43, 0.0  ;;  %v1088_v52 = vmax.f32 %v1024_v44, 0.0 }
  0xf8   :  { %v1659_v53 = vpack.c.bf16 %v1058_v47, %v1057_v45  ;;  %v1739_v54 = vpack.c.bf16 %v1090_v48, %v1089_v46 }
  0xf9   :  { %v1654_v55 = vpack.c.bf16 %v1056_v51, %v1055_v49  ;;  %v1734_v56 = vpack.c.bf16 %v1088_v52, %v1087_v50  ;;  %v1877_v57 = vpop.f32.mrb[12].mxu0  ;;  %v1909_v58 = vpop.f32.mrb[12].mxu1 }
  0xfa   :  { %1795 = vst [vmem:[%s2293_s3 + $0x28] sm:$0xff] %v1659_v53   ;;  %1811 = vst [vmem:[%s2293_s3 + $0xa8] sm:$0xff] %v1739_v54   ;;  %v997_v59 = vadd.f32 %v1877_v57, %v2128_v35  ;;  %v1029_v60 = vadd.f32 %v1909_v58, %v2128_v35  ;;  %v574_v61 = vpop.f32.mrb[13].mxu0  ;;  %v702_v62 = vpop.f32.mrb[13].mxu1 }
  0xfb   :  { %1794 = vst [vmem:[%s2293_s3 + $0x20] sm:$0xff] %v1654_v55   ;;  %1810 = vst [vmem:[%s2293_s3 + $0xa0] sm:$0xff] %v1734_v56   ;;  %v995_v63 = vadd.f32 %v2128_v35, %v574_v61  ;;  %v1027_v0 = vadd.f32 %v2128_v35, %v702_v62  ;;  %v1878_v1 = vpop.f32.mrb[14].mxu0  ;;  %v1910_v2 = vpop.f32.mrb[14].mxu1 }
  0xfc   :  { %v998_v3 = vadd.f32 %v1878_v1, %v2128_v35  ;;  %v1030_v4 = vadd.f32 %v1910_v2, %v2128_v35  ;;  %v577_v5 = vpop.f32.mrb[15].mxu0  ;;  %v705_v6 = vpop.f32.mrb[15].mxu1  ;;  %v1061_v9 = vmax.f32 %v997_v59, 0.0  ;;  %v1093_v10 = vmax.f32 %v1029_v60, 0.0 }
  0xfd   :  { %v996_v7 = vadd.f32 %v2128_v35, %v577_v5  ;;  %v1028_v8 = vadd.f32 %v2128_v35, %v705_v6  ;;  %v1059_v13 = vmax.f32 %v995_v63, 0.0  ;;  %v1091_v14 = vmax.f32 %v1027_v0, 0.0 }
  0xfe   :  { %v1062_v11 = vmax.f32 %v998_v3, 0.0  ;;  %v1094_v12 = vmax.f32 %v1030_v4, 0.0 }
  0xff   :  { %v1060_v15 = vmax.f32 %v996_v7, 0.0  ;;  %v1092_v16 = vmax.f32 %v1028_v8, 0.0 }
 0x100   :  { %v1669_v17 = vpack.c.bf16 %v1062_v11, %v1061_v9  ;;  %v1749_v18 = vpack.c.bf16 %v1094_v12, %v1093_v10 }
 0x101   :  { %v1664_v19 = vpack.c.bf16 %v1060_v15, %v1059_v13  ;;  %v1744_v20 = vpack.c.bf16 %v1092_v16, %v1091_v14  ;;  %v1881_v21 = vpop.f32.mrb[16].mxu0  ;;  %v1913_v22 = vpop.f32.mrb[16].mxu1 }
 0x102   :  { %1797 = vst [vmem:[%s2293_s3 + $0x38] sm:$0xff] %v1669_v17   ;;  %1813 = vst [vmem:[%s2293_s3 + $0xb8] sm:$0xff] %v1749_v18   ;;  %v1001_v23 = vadd.f32 %v1881_v21, %v2128_v35  ;;  %v1033_v24 = vadd.f32 %v1913_v22, %v2128_v35  ;;  %v590_v25 = vpop.f32.mrb[17].mxu0  ;;  %v718_v26 = vpop.f32.mrb[17].mxu1 }
 0x103   :  { %1796 = vst [vmem:[%s2293_s3 + $0x30] sm:$0xff] %v1664_v19   ;;  %1812 = vst [vmem:[%s2293_s3 + $0xb0] sm:$0xff] %v1744_v20   ;;  %v999_v27 = vadd.f32 %v2128_v35, %v590_v25  ;;  %v1031_v28 = vadd.f32 %v2128_v35, %v718_v26  ;;  %v1882_v29 = vpop.f32.mrb[18].mxu0  ;;  %v1914_v30 = vpop.f32.mrb[18].mxu1 }
 0x104   :  { %v1002_v31 = vadd.f32 %v1882_v29, %v2128_v35  ;;  %v1034_v32 = vadd.f32 %v1914_v30, %v2128_v35  ;;  %v593_v33 = vpop.f32.mrb[19].mxu0  ;;  %v721_v34 = vpop.f32.mrb[19].mxu1  ;;  %v1065_v38 = vmax.f32 %v1001_v23, 0.0  ;;  %v1097_v39 = vmax.f32 %v1033_v24, 0.0 }
 0x105   :  { %v1000_v36 = vadd.f32 %v2128_v35, %v593_v33  ;;  %v1032_v37 = vadd.f32 %v2128_v35, %v721_v34  ;;  %v1063_v42 = vmax.f32 %v999_v27, 0.0  ;;  %v1095_v43 = vmax.f32 %v1031_v28, 0.0 }
 0x106   :  { %v1066_v40 = vmax.f32 %v1002_v31, 0.0  ;;  %v1098_v41 = vmax.f32 %v1034_v32, 0.0 }
 0x107   :  { %v1064_v44 = vmax.f32 %v1000_v36, 0.0  ;;  %v1096_v45 = vmax.f32 %v1032_v37, 0.0 }
 0x108   :  { %v1679_v46 = vpack.c.bf16 %v1066_v40, %v1065_v38  ;;  %v1759_v47 = vpack.c.bf16 %v1098_v41, %v1097_v39 }
 0x109   :  { %v1674_v48 = vpack.c.bf16 %v1064_v44, %v1063_v42  ;;  %v1754_v49 = vpack.c.bf16 %v1096_v45, %v1095_v43  ;;  %v1885_v50 = vpop.f32.mrb[20].mxu0  ;;  %v1917_v51 = vpop.f32.mrb[20].mxu1 }
 0x10a   :  { %1799 = vst [vmem:[%s2293_s3 + $0x48] sm:$0xff] %v1679_v46   ;;  %1815 = vst [vmem:[%s2293_s3 + $0xc8] sm:$0xff] %v1759_v47   ;;  %v1005_v52 = vadd.f32 %v1885_v50, %v2128_v35  ;;  %v1037_v53 = vadd.f32 %v1917_v51, %v2128_v35  ;;  %v606_v54 = vpop.f32.mrb[21].mxu0  ;;  %v734_v55 = vpop.f32.mrb[21].mxu1 }
 0x10b   :  { %1798 = vst [vmem:[%s2293_s3 + $0x40] sm:$0xff] %v1674_v48   ;;  %1814 = vst [vmem:[%s2293_s3 + $0xc0] sm:$0xff] %v1754_v49   ;;  %v1003_v56 = vadd.f32 %v2128_v35, %v606_v54  ;;  %v1035_v57 = vadd.f32 %v2128_v35, %v734_v55  ;;  %v1886_v58 = vpop.f32.mrb[22].mxu0  ;;  %v1918_v59 = vpop.f32.mrb[22].mxu1 }
 0x10c   :  { %v1006_v60 = vadd.f32 %v1886_v58, %v2128_v35  ;;  %v1038_v61 = vadd.f32 %v1918_v59, %v2128_v35  ;;  %v609_v62 = vpop.f32.mrb[23].mxu0  ;;  %v737_v63 = vpop.f32.mrb[23].mxu1  ;;  %v1069_v2 = vmax.f32 %v1005_v52, 0.0  ;;  %v1101_v3 = vmax.f32 %v1037_v53, 0.0 }
 0x10d   :  { %v1004_v0 = vadd.f32 %v2128_v35, %v609_v62  ;;  %v1036_v1 = vadd.f32 %v2128_v35, %v737_v63  ;;  %v1067_v6 = vmax.f32 %v1003_v56, 0.0  ;;  %v1099_v7 = vmax.f32 %v1035_v57, 0.0 }
 0x10e   :  { %v1070_v4 = vmax.f32 %v1006_v60, 0.0  ;;  %v1102_v5 = vmax.f32 %v1038_v61, 0.0 }
 0x10f   :  { %v1068_v8 = vmax.f32 %v1004_v0, 0.0  ;;  %v1100_v9 = vmax.f32 %v1036_v1, 0.0 }
 0x110   :  { %v1689_v10 = vpack.c.bf16 %v1070_v4, %v1069_v2  ;;  %v1769_v11 = vpack.c.bf16 %v1102_v5, %v1101_v3 }
 0x111   :  { %v1684_v12 = vpack.c.bf16 %v1068_v8, %v1067_v6  ;;  %v1764_v13 = vpack.c.bf16 %v1100_v9, %v1099_v7  ;;  %v1889_v14 = vpop.f32.mrb[24].mxu0  ;;  %v1921_v15 = vpop.f32.mrb[24].mxu1 }
 0x112   :  { %1801 = vst [vmem:[%s2293_s3 + $0x58] sm:$0xff] %v1689_v10   ;;  %1817 = vst [vmem:[%s2293_s3 + $0xd8] sm:$0xff] %v1769_v11   ;;  %v1009_v16 = vadd.f32 %v1889_v14, %v2128_v35  ;;  %v1041_v17 = vadd.f32 %v1921_v15, %v2128_v35  ;;  %v622_v18 = vpop.f32.mrb[25].mxu0  ;;  %v750_v19 = vpop.f32.mrb[25].mxu1 }
 0x113   :  { %1800 = vst [vmem:[%s2293_s3 + $0x50] sm:$0xff] %v1684_v12   ;;  %1816 = vst [vmem:[%s2293_s3 + $0xd0] sm:$0xff] %v1764_v13   ;;  %v1007_v20 = vadd.f32 %v2128_v35, %v622_v18  ;;  %v1039_v21 = vadd.f32 %v2128_v35, %v750_v19  ;;  %v1890_v22 = vpop.f32.mrb[26].mxu0  ;;  %v1922_v23 = vpop.f32.mrb[26].mxu1 }
 0x114   :  { %v1010_v24 = vadd.f32 %v1890_v22, %v2128_v35  ;;  %v1042_v25 = vadd.f32 %v1922_v23, %v2128_v35  ;;  %v625_v26 = vpop.f32.mrb[27].mxu0  ;;  %v753_v27 = vpop.f32.mrb[27].mxu1  ;;  %v1073_v30 = vmax.f32 %v1009_v16, 0.0  ;;  %v1105_v31 = vmax.f32 %v1041_v17, 0.0 }
 0x115   :  { %v1008_v28 = vadd.f32 %v2128_v35, %v625_v26  ;;  %v1040_v29 = vadd.f32 %v2128_v35, %v753_v27  ;;  %v1071_v34 = vmax.f32 %v1007_v20, 0.0  ;;  %v1103_v36 = vmax.f32 %v1039_v21, 0.0 }
 0x116   :  { %v1074_v32 = vmax.f32 %v1010_v24, 0.0  ;;  %v1106_v33 = vmax.f32 %v1042_v25, 0.0 }
 0x117   :  { %v1072_v37 = vmax.f32 %v1008_v28, 0.0  ;;  %v1104_v38 = vmax.f32 %v1040_v29, 0.0 }
 0x118   :  { %v1699_v39 = vpack.c.bf16 %v1074_v32, %v1073_v30  ;;  %v1779_v40 = vpack.c.bf16 %v1106_v33, %v1105_v31 }
 0x119   :  { %v1694_v41 = vpack.c.bf16 %v1072_v37, %v1071_v34  ;;  %v1774_v42 = vpack.c.bf16 %v1104_v38, %v1103_v36  ;;  %v1893_v43 = vpop.f32.mrb[28].mxu0  ;;  %v1925_v44 = vpop.f32.mrb[28].mxu1 }
 0x11a   :  { %1803 = vst [vmem:[%s2293_s3 + $0x68] sm:$0xff] %v1699_v39   ;;  %1819 = vst [vmem:[%s2293_s3 + $0xe8] sm:$0xff] %v1779_v40   ;;  %v1013_v45 = vadd.f32 %v1893_v43, %v2128_v35  ;;  %v1045_v46 = vadd.f32 %v1925_v44, %v2128_v35  ;;  %v638_v47 = vpop.f32.mrb[29].mxu0  ;;  %v766_v48 = vpop.f32.mrb[29].mxu1 }
 0x11b   :  { %1802 = vst [vmem:[%s2293_s3 + $0x60] sm:$0xff] %v1694_v41   ;;  %1818 = vst [vmem:[%s2293_s3 + $0xe0] sm:$0xff] %v1774_v42   ;;  %v1011_v49 = vadd.f32 %v2128_v35, %v638_v47  ;;  %v1043_v50 = vadd.f32 %v2128_v35, %v766_v48  ;;  %v1894_v51 = vpop.f32.mrb[30].mxu0  ;;  %v1926_v52 = vpop.f32.mrb[30].mxu1 }
 0x11c   :  { %v1014_v53 = vadd.f32 %v1894_v51, %v2128_v35  ;;  %v1046_v54 = vadd.f32 %v1926_v52, %v2128_v35  ;;  %v641_v55 = vpop.f32.mrb[31].mxu0  ;;  %v769_v56 = vpop.f32.mrb[31].mxu1  ;;  %v1077_v59 = vmax.f32 %v1013_v45, 0.0  ;;  %v1109_v60 = vmax.f32 %v1045_v46, 0.0 }
 0x11d   :  { %v1012_v57 = vadd.f32 %v2128_v35, %v641_v55  ;;  %v1044_v58 = vadd.f32 %v2128_v35, %v769_v56  ;;  %v1075_v63 = vmax.f32 %v1011_v49, 0.0  ;;  %v1107_v0 = vmax.f32 %v1043_v50, 0.0 }
 0x11e   :  { %v1078_v61 = vmax.f32 %v1014_v53, 0.0  ;;  %v1110_v62 = vmax.f32 %v1046_v54, 0.0 }
 0x11f   :  { %v1076_v1 = vmax.f32 %v1012_v57, 0.0  ;;  %v1108_v2 = vmax.f32 %v1044_v58, 0.0 }
 0x120   :  { %v1709_v3 = vpack.c.bf16 %v1078_v61, %v1077_v59  ;;  %v1789_v4 = vpack.c.bf16 %v1110_v62, %v1109_v60 }
 0x121   :  { %v1704_v5 = vpack.c.bf16 %v1076_v1, %v1075_v63  ;;  %v1784_v6 = vpack.c.bf16 %v1108_v2, %v1107_v0 }
 0x122   :  { %1805 = vst [vmem:[%s2293_s3 + $0x78] sm:$0xff] %v1709_v3   ;;  %1821 = vst [vmem:[%s2293_s3 + $0xf8] sm:$0xff] %v1789_v4  }
 0x123   :  { %1804 = vst [vmem:[%s2293_s3 + $0x70] sm:$0xff] %v1704_v5   ;;  %1820 = vst [vmem:[%s2293_s3 + $0xf0] sm:$0xff] %v1784_v6  }

</bundles_post_ra>
